<compile_context>
chip_gen: v7x
topology: tpu7x:2x2x1
jax: 0.10.0
libtpu: 0.0.40
codegen_flags: <defaults>
</compile_context>

<pallas_src>
import jax
import jax.numpy as jnp
from jax.experimental import pallas as pl
from jax.experimental.pallas import tpu as pltpu

IN_DIM = 256
HID_DIM = 256
OUT_DIM = 10
OUT_PAD = 16  # narrow pad of the output lane dim (block == full last dim -> legal)


def _round_up(x, m):
    return ((x + m - 1) // m) * m


def label_predictor_kernel(h_ref, w1_ref, b1_ref, w2_ref, b2_ref, o_ref):
    # h_ref:  [TM, 256] f32      w1_ref: [256, 256] bf16   b1_ref: [1, 256] f32
    # w2_ref: [256, 16] bf16     b2_ref: [1, 16]  f32      o_ref:  [TM, 16] f32
    h = h_ref[...].astype(jnp.bfloat16)  # in-kernel cast: hidden under the h DMA
    z1 = jnp.dot(h, w1_ref[...], preferred_element_type=jnp.float32) + b1_ref[...]
    # Dropout (eval mode) == identity, then ReLU in f32 on the VPU.
    a1 = jnp.maximum(z1, 0.0)
    z2 = jnp.dot(a1.astype(jnp.bfloat16), w2_ref[...],
                 preferred_element_type=jnp.float32) + b2_ref[...]
    o_ref[...] = z2.astype(o_ref.dtype)


def prepare_params(w1, b1, w2, b2):
    """One-time weight pad/cast (keeps the per-call path free of extra XLA passes).

    Weights are stored [in, out] (transposed vs. PyTorch nn.Linear.weight)."""
    w1_bf = w1.astype(jnp.bfloat16)                                   # [256, 256] bf16
    b1_f = jnp.reshape(b1, (1, HID_DIM)).astype(jnp.float32)          # [1, 256]  f32
    w2_p = jnp.pad(w2, ((0, 0), (0, OUT_PAD - OUT_DIM))).astype(jnp.bfloat16)   # [256, 16]
    b2_p = jnp.pad(jnp.reshape(b2, (1, OUT_DIM)),
                   ((0, 0), (0, OUT_PAD - OUT_DIM))).astype(jnp.float32)        # [1, 16]
    return w1_bf, b1_f, w2_p, b2_p


def label_predictor(h, params, block_m=2048):
    """out = relu(h @ w1 + b1) @ w2 + b2 (eval-mode dropout == identity)."""
    w1_bf, b1_f, w2_p, b2_p = params
    B, K = h.shape
    assert K == IN_DIM

    # Batch tile: as large as fits comfortably in scoped VMEM on every generation.
    TM = min(block_m, _round_up(B, 8))
    # v7x has 2 TensorCores: keep >= 2 grid steps on the "parallel" batch axis when the
    # batch is big enough to split (no effect on v5e/v6e which have 1 TC).
    if B > 512 and pl.cdiv(B, TM) < 2:
        TM = _round_up(pl.cdiv(B, 2), 256)

    grid = (pl.cdiv(B, TM),)  # ragged last block handled by Pallas; no batch padding pass

    flops = 2 * B * IN_DIM * (HID_DIM + OUT_PAD)
    bytes_accessed = int(
        h.size * h.dtype.itemsize          # h stream (dominant)
        + w1_bf.size * 2 + w2_p.size * 2   # bf16 weights
        + b1_f.size * 4 + b2_p.size * 4    # f32 biases
        + B * OUT_PAD * 4                  # narrow f32 output writeback
    )

    out = pl.pallas_call(
        label_predictor_kernel,
        out_shape=jax.ShapeDtypeStruct((B, OUT_PAD), jnp.float32),
        grid_spec=pltpu.PrefetchScalarGridSpec(
            num_scalar_prefetch=0,
            grid=grid,
            in_specs=[
                pl.BlockSpec((TM, IN_DIM), lambda i: (i, 0)),        # h: pipelined over batch
                pl.BlockSpec((IN_DIM, HID_DIM), lambda i: (0, 0)),   # w1: VMEM-resident
                pl.BlockSpec((1, HID_DIM), lambda i: (0, 0)),        # b1: VMEM-resident
                pl.BlockSpec((HID_DIM, OUT_PAD), lambda i: (0, 0)),  # w2 (padded): VMEM-resident
                pl.BlockSpec((1, OUT_PAD), lambda i: (0, 0)),        # b2 (padded): VMEM-resident
            ],
            out_specs=pl.BlockSpec((TM, OUT_PAD), lambda i: (i, 0)),
        ),
        compiler_params=pltpu.CompilerParams(
            dimension_semantics=("parallel",),  # independent batch tiles (2 TCs on v7x)
        ),
        cost_estimate=pl.CostEstimate(flops=flops, transcendentals=0,
                                      bytes_accessed=bytes_accessed),
    )(h, w1_bf, b1_f, w2_p, b2_p)

    # Narrow slice (16 -> 10 lanes) is cheap; under jit it fuses into the consumer.
    return out[:, :OUT_DIM]


def init_params(key):
    # Mimic PyTorch nn.Linear default init: U(-1/sqrt(fan_in), 1/sqrt(fan_in)).
    k1, k2, k3, k4 = jax.random.split(key, 4)
    bound1 = 1.0 / (IN_DIM ** 0.5)
    w1 = jax.random.uniform(k1, (IN_DIM, HID_DIM), jnp.float32, -bound1, bound1)  # [in, out]
    b1 = jax.random.uniform(k2, (1, HID_DIM), jnp.float32, -bound1, bound1)
    bound2 = 1.0 / (HID_DIM ** 0.5)
    w2 = jax.random.uniform(k3, (HID_DIM, OUT_DIM), jnp.float32, -bound2, bound2)  # [in, out]
    b2 = jax.random.uniform(k4, (1, OUT_DIM), jnp.float32, -bound2, bound2)
    return w1, b1, w2, b2


if __name__ == "__main__":
    key = jax.random.PRNGKey(0)
    kx, kp = jax.random.split(key)

    B = 8  # small demo batch (the kernel's tiling pays off for B in the thousands)
    h = jax.random.normal(kx, (B, IN_DIM), jnp.float32)
    w1, b1, w2, b2 = init_params(kp)

    params = prepare_params(w1, b1, w2, b2)  # one-time pad/cast of the tiny weights

    fwd = jax.jit(label_predictor)
    out = jax.block_until_ready(fwd(h, params))

    # Sanity check against pure-JAX f32 reference (eval-mode forward).
    # Tolerance loosened because the kernel intentionally uses bf16 matmul inputs
    # (f32 accumulation) to halve the dominant HBM streams.
    ref = jnp.maximum(h @ w1 + b1, 0.0) @ w2 + b2
    assert out.shape == (B, OUT_DIM)
    assert jnp.allclose(out, ref, atol=5e-2, rtol=5e-2), float(jnp.max(jnp.abs(out - ref)))

    print("KERNEL_OK")
</pallas_src>

<mosaic_0001>
module attributes {stable_mosaic.version = 11 : i64} {
  func.func @label_predictor_kernel(%arg0: i32, %arg1: memref<8x256xf32, #tpu.memory_space<vmem>>, %arg2: memref<256x256xbf16, #tpu.memory_space<vmem>>, %arg3: memref<1x256xf32, #tpu.memory_space<vmem>>, %arg4: memref<256x16xbf16, #tpu.memory_space<vmem>>, %arg5: memref<1x16xf32, #tpu.memory_space<vmem>>, %arg6: memref<8x16xf32, #tpu.memory_space<vmem>>) attributes {dimension_semantics = [#tpu.dimension_semantics<parallel>], iteration_bounds = array<i64: 1>, scalar_prefetch = 0 : i64, scratch_operands = 0 : i64, tpu.core_type = #tpu.core_type<tc>, window_params = [{transform_indices = @transform_0, window_bounds = array<i64: 8, 256>}, {pipeline_mode = #tpu.pipeline_mode<synchronous>, transform_indices = @transform_1, window_bounds = array<i64: 256, 256>}, {pipeline_mode = #tpu.pipeline_mode<synchronous>, transform_indices = @transform_2, window_bounds = array<i64: 1, 256>}, {pipeline_mode = #tpu.pipeline_mode<synchronous>, transform_indices = @transform_3, window_bounds = array<i64: 256, 16>}, {pipeline_mode = #tpu.pipeline_mode<synchronous>, transform_indices = @transform_4, window_bounds = array<i64: 1, 16>}, {transform_indices = @transform_5, window_bounds = array<i64: 8, 16>}]} {
    %c0 = arith.constant 0 : index
    %c0_0 = arith.constant 0 : index
    %0 = vector.load %arg1[%c0, %c0_0] : memref<8x256xf32, #tpu.memory_space<vmem>>, vector<8x256xf32>
    %1 = arith.truncf %0 : vector<8x256xf32> to vector<8x256xbf16>
    %c0_1 = arith.constant 0 : index
    %c0_2 = arith.constant 0 : index
    %2 = vector.load %arg2[%c0_1, %c0_2] : memref<256x256xbf16, #tpu.memory_space<vmem>>, vector<256x256xbf16>
    %cst = arith.constant dense<0.000000e+00> : vector<8x256xf32>
    %3 = tpu.matmul %1, %2, %cst {dimension_numbers = #tpu.dot_dimension_numbers<[1], [0], [0], [1], [0, 0, 1, 1], [], []>} : vector<8x256xbf16>, vector<256x256xbf16>, vector<8x256xf32> -> vector<8x256xf32>
    %c0_3 = arith.constant 0 : index
    %c0_4 = arith.constant 0 : index
    %4 = vector.load %arg3[%c0_3, %c0_4] : memref<1x256xf32, #tpu.memory_space<vmem>>, vector<1x256xf32>
    %5 = vector.broadcast %4 : vector<1x256xf32> to vector<8x256xf32>
    %6 = arith.addf %3, %5 : vector<8x256xf32>
    %cst_5 = arith.constant 0.000000e+00 : f32
    %7 = vector.broadcast %cst_5 : f32 to vector<8x256xf32>
    %8 = arith.maximumf %6, %7 : vector<8x256xf32>
    %9 = arith.truncf %8 : vector<8x256xf32> to vector<8x256xbf16>
    %c0_6 = arith.constant 0 : index
    %c0_7 = arith.constant 0 : index
    %10 = vector.load %arg4[%c0_6, %c0_7] : memref<256x16xbf16, #tpu.memory_space<vmem>>, vector<256x16xbf16>
    %cst_8 = arith.constant dense<0.000000e+00> : vector<8x16xf32>
    %11 = tpu.matmul %9, %10, %cst_8 {dimension_numbers = #tpu.dot_dimension_numbers<[1], [0], [0], [1], [0, 0, 1, 1], [], []>} : vector<8x256xbf16>, vector<256x16xbf16>, vector<8x16xf32> -> vector<8x16xf32>
    %c0_9 = arith.constant 0 : index
    %c0_10 = arith.constant 0 : index
    %12 = vector.load %arg5[%c0_9, %c0_10] : memref<1x16xf32, #tpu.memory_space<vmem>>, vector<1x16xf32>
    %13 = vector.broadcast %12 : vector<1x16xf32> to vector<8x16xf32>
    %14 = arith.addf %11, %13 : vector<8x16xf32>
    %c0_11 = arith.constant 0 : index
    %c0_12 = arith.constant 0 : index
    %15 = vector.load %arg6[%c0_11, %c0_12] : memref<8x16xf32, #tpu.memory_space<vmem>>, vector<8x16xf32>
    tpu.vector_store %arg6[%c0_11, %c0_12], %14 {strides = array<i32>} : memref<8x16xf32, #tpu.memory_space<vmem>>, vector<8x16xf32>,
    return
  }
  func.func @transform_0(%arg0: i32) -> (i32, i32) {
    %c0_i32 = arith.constant 0 : i32
    %c0_i32_0 = arith.constant 0 : i32
    return %arg0, %c0_i32 : i32, i32
  }
  func.func @transform_1(%arg0: i32) -> (i32, i32) {
    %c0_i32 = arith.constant 0 : i32
    %c0_i32_0 = arith.constant 0 : i32
    %c0_i32_1 = arith.constant 0 : i32
    return %c0_i32, %c0_i32_0 : i32, i32
  }
  func.func @transform_2(%arg0: i32) -> (i32, i32) {
    %c0_i32 = arith.constant 0 : i32
    %c0_i32_0 = arith.constant 0 : i32
    %c0_i32_1 = arith.constant 0 : i32
    return %c0_i32, %c0_i32_0 : i32, i32
  }
  func.func @transform_3(%arg0: i32) -> (i32, i32) {
    %c0_i32 = arith.constant 0 : i32
    %c0_i32_0 = arith.constant 0 : i32
    %c0_i32_1 = arith.constant 0 : i32
    return %c0_i32, %c0_i32_0 : i32, i32
  }
  func.func @transform_4(%arg0: i32) -> (i32, i32) {
    %c0_i32 = arith.constant 0 : i32
    %c0_i32_0 = arith.constant 0 : i32
    %c0_i32_1 = arith.constant 0 : i32
    return %c0_i32, %c0_i32_0 : i32, i32
  }
  func.func @transform_5(%arg0: i32) -> (i32, i32) {
    %c0_i32 = arith.constant 0 : i32
    %c0_i32_0 = arith.constant 0 : i32
    return %arg0, %c0_i32 : i32, i32
  }
}

</mosaic_0001>

<bundles_post_ra>
// kernel: label_predictor.1
= control target key start
LH: loop header
LB: loop body
LE: loop exit
PB: predicated region body
PF: predicated region fallthrough
CT: control target
= control target key end

     0   :  { %10 = vsyncpa [#allocation3], 0  ;;  %s786_s0 = inlined_call_operand.vmem [shape: f32[8,256], index: 0, kind: input, shape index: {}]   ;;  %s787_s1 = inlined_call_operand.hbm [shape: bf16[256,256], index: 1, kind: input, shape index: {}]   ;;  %s788_s2 = inlined_call_operand.vmem [shape: f32[1,256], index: 2, kind: input, shape index: {}]   ;;  %s789_s3 = inlined_call_operand.vmem [shape: bf16[256,16], index: 3, kind: input, shape index: {}]   ;;  %s790_s4 = inlined_call_operand.vmem [shape: f32[1,16], index: 4, kind: input, shape index: {}]   ;;  %s791_s5 = inlined_call_operand.hbm [shape: f32[8,16], index: 5, kind: output, shape index: {}]  }
   0x1   :  { %11 = vsyncpa [#allocation4], 0  ;;  %s668_s18 = smov [#allocation2]   ;;  %s620_s22 = scalar_lea.hbm %s787_s1, 4096 }
   0x2   :  { %s19_s19 = sshll.u32 %s668_s18, 4  ;;  %p621_p0 = scmp.ne.s32.totalorder %s787_s1, %s620_s22  ;;  %s20_s19 = int_to_ptr.vmem [resolvable:$true] %s19_s19 }
   0x3   :  { %p624_p1 = scmp.lt.u32.totalorder %s620_s22, %s787_s1 }
   0x5   :  { %p626_p2 = pnand %p624_p1, %p621_p0 }
   0x7   :  { %629 = shalt.err (!%p626_p2)
}
   0x8   :  { %s630_s27 = scalar_lea.vmem %s20_s19, 4096  ;;  %p635_p4 = scmp.lt.s32.totalorder %s20_s19, %s20_s19 }
   0x9   :  { %p631_p3 = scmp.ne.s32.totalorder %s20_s19, %s630_s27  ;;  %p636_p5 = scmp.lt.s32.totalorder %s630_s27, %s630_s27 }
   0xb   :  { %p637_p6 = por %p636_p5, %p635_p4 }
   0xd   :  { %p638_p7 = pnand %p637_p6, %p631_p3 }
   0xf   :  { %641 = shalt.err (!%p638_p7)
}
  0x10   :  { %s669_s28 = smov 128   ;;  %s670_s29 = smov 8  }
  0x11   :  { %25 = dma.hbm_to_vmem [thread:$0]  %s787_s1, 4096, %s20_s19, [#allocation3], %s669_s28, %s669_s28, %s670_s29  }
  0x12   :  { %664 = dma.done.wait [#allocation3], 4096  }
  0x13   :  { %665 = vsyncadd [#allocation3], 4294963200  ;;  %v556_v0 = vld [vmem:[#allocation2 + $0x4] ss:$8 sps:$4 sm:$0xff]   ;;  %v558_v1 = vld [vmem:[#allocation2] ss:$8 sps:$4 sm:$0xff]   ;;  %v74_v52 = vlaneseq }
  0x14   :  { %244 = vmatprep.subr.bf16.mxu0 %v556_v0  ;;  %v559_v2 = vld [vmem:[#allocation2 + $0x14] ss:$8 sps:$4 sm:$0xff]   ;;  %v561_v3 = vld [vmem:[#allocation2 + $0x10] ss:$8 sps:$4 sm:$0xff]   ;;  %v562_v4 = vld [vmem:[#allocation2 + $0x24] ss:$8 sps:$4 sm:$0xff]  }
  0x15   :  { %245 = vmatpush1.bf16.msra.mxu0 %v558_v1  ;;  %v564_v5 = vld [vmem:[#allocation2 + $0x20] ss:$8 sps:$4 sm:$0xff]   ;;  %v565_v6 = vld [vmem:[#allocation2 + $0x34] ss:$8 sps:$4 sm:$0xff]   ;;  %v567_v7 = vld [vmem:[#allocation2 + $0x30] ss:$8 sps:$4 sm:$0xff]  }
  0x16   :  { %246 = vmatprep.subr.bf16.mxu0 %v559_v2  ;;  %v568_v8 = vld [vmem:[#allocation2 + $0x44] ss:$8 sps:$4 sm:$0xff]   ;;  %v570_v9 = vld [vmem:[#allocation2 + $0x40] ss:$8 sps:$4 sm:$0xff]   ;;  %v571_v10 = vld [vmem:[#allocation2 + $0x54] ss:$8 sps:$4 sm:$0xff]  }
  0x17   :  { %v573_v11 = vld [vmem:[#allocation2 + $0x50] ss:$8 sps:$4 sm:$0xff]   ;;  %v574_v12 = vld [vmem:[#allocation2 + $0x64] ss:$8 sps:$4 sm:$0xff]   ;;  %v576_v13 = vld [vmem:[#allocation2 + $0x60] ss:$8 sps:$4 sm:$0xff]  }
  0x18   :  { %v37_v14 = vld [vmem:[%s786_s0 + $0x8] sm:$0xff]  ;;  %v577_v15 = vld [vmem:[#allocation2 + $0x74] ss:$8 sps:$4 sm:$0xff]   ;;  %v604_v17 = vld [vmem:[%s789_s3 + $0x40] sm:$0xff]   ;;  %v75_v53 = vshrl.u32 %v74_v52, 7  ;;  %vm464_vm0 = vcmask 130048  }
  0x19   :  { %247 = vmatpush1.bf16.msra.mxu0 %v561_v3  ;;  %v39_v16 = vpack.c.bf16 %v37_v14, %v37_v14  ;;  %v605_v18 = vld [vmem:[%s789_s3] sm:$0xff]   ;;  %v606_v19 = vld [vmem:[%s789_s3 + $0x48] sm:$0xff]   ;;  %v579_v20 = vld [vmem:[#allocation2 + $0x70] ss:$8 sps:$4 sm:$0xff]   ;;  %530 = vmatprep.subr.bf16.mxu1 %v604_v17 }
  0x1a   :  { %248 = vmatprep.subr.bf16.mxu0 %v562_v4  ;;  %531 = vmatpush3.bf16.msra.mxu1 %v605_v18  ;;  %v607_v21 = vld [vmem:[%s789_s3 + $0x8] sm:$0xff]   ;;  %v608_v22 = vld [vmem:[%s789_s3 + $0x50] sm:$0xff]   ;;  %v610_v26 = vld [vmem:[%s789_s3 + $0x58] sm:$0xff]   ;;  %v76_v54 = vsub.s32 0, %v75_v53  ;;  %v80_v56 = vsub.s32 1, %v75_v53 }
  0x1b   :  { %276 = vmatprep.mubr.bf16.mxu0 %v39_v16  ;;  %532 = vmatprep.subr.bf16.mxu1 %v606_v19  ;;  %v580_v23 = vld [vmem:[#allocation2 + $0x84] ss:$8 sps:$4 sm:$0xff]   ;;  %v582_v24 = vld [vmem:[#allocation2 + $0x80] ss:$8 sps:$4 sm:$0xff]   ;;  %v609_v25 = vld [vmem:[%s789_s3 + $0x10] sm:$0xff]  }
  0x1c   :  { %v583_v27 = vld [vmem:[#allocation2 + $0x94] ss:$8 sps:$4 sm:$0xff]   ;;  %v585_v28 = vld [vmem:[#allocation2 + $0x90] ss:$8 sps:$4 sm:$0xff]   ;;  %v586_v30 = vld [vmem:[#allocation2 + $0xa4] ss:$8 sps:$4 sm:$0xff]  }
  0x1d   :  { %249 = vmatpush1.bf16.msra.mxu0 %v564_v5  ;;  %v611_v29 = vld [vmem:[%s789_s3 + $0x18] sm:$0xff]   ;;  %v612_v31 = vld [vmem:[%s789_s3 + $0x60] sm:$0xff]   ;;  %v614_v34 = vld [vmem:[%s789_s3 + $0x68] sm:$0xff]  }
  0x1e   :  { %250 = vmatprep.subr.bf16.mxu0 %v565_v6  ;;  %533 = vmatpush3.bf16.msra.mxu1 %v607_v21  ;;  %v613_v32 = vld [vmem:[%s789_s3 + $0x20] sm:$0xff]   ;;  %v589_v35 = vld [vmem:[#allocation2 + $0xb4] ss:$8 sps:$4 sm:$0xff]   ;;  %v615_v36 = vld [vmem:[%s789_s3 + $0x28] sm:$0xff]  }
  0x1f   :  { %534 = vmatprep.subr.bf16.mxu1 %v608_v22  ;;  %v588_v33 = vld [vmem:[#allocation2 + $0xa0] ss:$8 sps:$4 sm:$0xff]   ;;  %v591_v37 = vld [vmem:[#allocation2 + $0xb0] ss:$8 sps:$4 sm:$0xff]   ;;  %v592_v38 = vld [vmem:[#allocation2 + $0xc4] ss:$8 sps:$4 sm:$0xff]  }
  0x20   :  { %v594_v39 = vld [vmem:[#allocation2 + $0xc0] ss:$8 sps:$4 sm:$0xff]   ;;  %v595_v40 = vld [vmem:[#allocation2 + $0xd4] ss:$8 sps:$4 sm:$0xff]   ;;  %v597_v41 = vld [vmem:[#allocation2 + $0xd0] ss:$8 sps:$4 sm:$0xff]  }
  0x21   :  { %251 = vmatpush1.bf16.msra.mxu0 %v567_v7  ;;  %v598_v42 = vld [vmem:[#allocation2 + $0xe4] ss:$8 sps:$4 sm:$0xff]   ;;  %v600_v43 = vld [vmem:[#allocation2 + $0xe0] ss:$8 sps:$4 sm:$0xff]   ;;  %v601_v44 = vld [vmem:[#allocation2 + $0xf4] ss:$8 sps:$4 sm:$0xff]  }
  0x22   :  { %252 = vmatprep.subr.bf16.mxu0 %v568_v8  ;;  %535 = vmatpush3.bf16.msra.mxu1 %v609_v25  ;;  %v603_v45 = vld [vmem:[#allocation2 + $0xf0] ss:$8 sps:$4 sm:$0xff]   ;;  %v36_v46 = vld [vmem:[%s786_s0] sm:$0xff] }
  0x23   :  { %536 = vmatprep.subr.bf16.mxu1 %v610_v26  ;;  %v38_v47 = vpack.c.bf16 %v36_v46, %v36_v46  ;;  %v616_v48 = vld [vmem:[%s789_s3 + $0x70] sm:$0xff]   ;;  %v618_v50 = vld [vmem:[%s789_s3 + $0x78] sm:$0xff]   ;;  %v72_v55 = vld [vmem:[%s788_s2] sm:$0x3]  ;;  %s671_s2 = smov [#allocation5]  }
  0x24   :  { %v617_v49 = vld [vmem:[%s789_s3 + $0x30] sm:$0xff]   ;;  %v619_v51 = vld [vmem:[%s789_s3 + $0x38] sm:$0xff]   ;;  %v77_v57 = vrot.slane %v72_v55, %v76_v54  ;;  %v81_v58 = vrot.slane %v72_v55, %v80_v56  ;;  %v513_v6 = vld [vmem:[%s790_s4] ss:$0 sm:$0xff]  ;;  %s472_s18 = sshll.u32 %s671_s2, 4  ;;  %s473_s18 = int_to_ptr.vmem [resolvable:$true] %s472_s18 }
  0x25   :  { %253 = vmatpush1.bf16.msra.mxu0 %v570_v9  ;;  %s642_s19 = scalar_lea.vmem %s473_s18, 128  ;;  %p647_p9 = scmp.lt.s32.totalorder %s473_s18, %s473_s18 }
  0x26   :  { %254 = vmatprep.subr.bf16.mxu0 %v571_v10  ;;  %537 = vmatpush3.bf16.msra.mxu1 %v611_v29  ;;  %p643_p8 = scmp.ne.s32.totalorder %s473_s18, %s642_s19  ;;  %p648_p10 = scmp.lt.s32.totalorder %s642_s19, %s642_s19 }
  0x27   :  { %538 = vmatprep.subr.bf16.mxu1 %v612_v31 }
  0x28   :  { %p649_p11 = por %p648_p10, %p647_p9 }
  0x29   :  { %255 = vmatpush1.bf16.msra.mxu0 %v573_v11 }
  0x2a   :  { %256 = vmatprep.subr.bf16.mxu0 %v574_v12  ;;  %539 = vmatpush3.bf16.msra.mxu1 %v613_v32  ;;  %p650_p12 = pnand %p649_p11, %p643_p8 }
  0x2b   :  { %540 = vmatprep.subr.bf16.mxu1 %v614_v34 }
  0x2d   :  { %257 = vmatpush1.bf16.msra.mxu0 %v576_v13 }
  0x2e   :  { %258 = vmatprep.subr.bf16.mxu0 %v577_v15  ;;  %541 = vmatpush3.bf16.msra.mxu1 %v615_v36 }
  0x2f   :  { %542 = vmatprep.subr.bf16.mxu1 %v616_v48 }
  0x31   :  { %259 = vmatpush1.bf16.msra.mxu0 %v579_v20 }
  0x32   :  { %260 = vmatprep.subr.bf16.mxu0 %v580_v23  ;;  %543 = vmatpush3.bf16.msra.mxu1 %v617_v49 }
  0x33   :  { %544 = vmatprep.subr.bf16.mxu1 %v618_v50 }
  0x35   :  { %261 = vmatpush1.bf16.msra.mxu0 %v582_v24 }
  0x36   :  { %262 = vmatprep.subr.bf16.mxu0 %v583_v27  ;;  %545 = vmatpush3.bf16.msra.mxu1 %v619_v51 }
  0x39   :  { %263 = vmatpush1.bf16.msra.mxu0 %v585_v28 }
  0x3a   :  { %264 = vmatprep.subr.bf16.mxu0 %v586_v30 }
  0x3d   :  { %265 = vmatpush1.bf16.msra.mxu0 %v588_v33 }
  0x3e   :  { %266 = vmatprep.subr.bf16.mxu0 %v589_v35 }
  0x41   :  { %267 = vmatpush1.bf16.msra.mxu0 %v591_v37 }
  0x42   :  { %268 = vmatprep.subr.bf16.mxu0 %v592_v38 }
  0x45   :  { %269 = vmatpush1.bf16.msra.mxu0 %v594_v39 }
  0x46   :  { %270 = vmatprep.subr.bf16.mxu0 %v595_v40 }
  0x49   :  { %271 = vmatpush1.bf16.msra.mxu0 %v597_v41 }
  0x4a   :  { %272 = vmatprep.subr.bf16.mxu0 %v598_v42 }
  0x4d   :  { %273 = vmatpush1.bf16.msra.mxu0 %v600_v43 }
  0x4e   :  { %274 = vmatprep.subr.bf16.mxu0 %v601_v44 }
  0x51   :  { %275 = vmatpush1.bf16.msra.mxu0 %v603_v45 }
  0x54   :  { %277 = vmatmul.mubr.bf16.vlgmr.msra.gmra.mrb[0].mxu0 %v38_v47 }
 0x127   :  { %v278_v59 = vpop.f32.mrb[0].mxu0 }
 0x128   :  { %v279_v60 = vadd.f32 %v278_v59, %v77_v57  ;;  %v280_v61 = vpop.f32.mrb[1].mxu0 }
 0x129   :  { %v281_v62 = vadd.f32 %v280_v61, %v81_v58  ;;  %v282_v63 = vpop.f32.mrb[2].mxu0 }
 0x12a   :  { %v285_v0 = vmax.f32 %v279_v60, 0.0  ;;  %v283_v1 = vpop.f32.mrb[3].mxu0 }
 0x12b   :  { %v286_v2 = vmax.f32 %v281_v62, 0.0 }
 0x12c   :  { %v287_v4 = vpack.c.bf16 %v285_v0, %v285_v0 }
 0x12d   :  { %v288_v3 = vpack.c.bf16 %v286_v2, %v286_v2 }
 0x12f   :  { %456 = vmatprep.mubr.bf16.mxu1 %v288_v3 }
 0x130   :  { %457 = vmatmul.mubr.bf16.vlgmr.msra.gmra.mrb[0].mxu1 %v287_v4 }
 0x203   :  { %v546_v5 = vpop.f32.mrb[0].mxu1 }
 0x204   :  { %v547_v7 = vpop.f32.mrb[1].mxu1 }
 0x205   :  { %v548_v8 = vadd.f32 %v547_v7, %v546_v5  ;;  %v549_v9 = vpop.f32.mrb[2].mxu1 }
 0x206   :  { %v550_v10 = vpop.f32.mrb[3].mxu1 }
 0x207   :  { %v459_v11 = vadd.f32 %v548_v8, %v513_v6 }
 0x209   :  { %465 = vst.msk [vmem:[#allocation5] sm:$0xff] %vm464_vm0, %v459_v11 }
 0x20a   :  { %653 = shalt.err (!%p650_p12)
}
 0x20b   :  { %s654_s4 = scalar_lea.hbm %s791_s5, 128 }
 0x20c   :  { %p655_p13 = scmp.ne.s32.totalorder %s791_s5, %s654_s4  ;;  %p658_p0 = scmp.lt.u32.totalorder %s654_s4, %s791_s5 }
 0x20e   :  { %p660_p1 = pnand %p658_p0, %p655_p13 }
 0x210   :  { %663 = shalt.err (!%p660_p1)
}
 0x211   :  { %475 = dma.vmem_to_hbm [thread:$0]  %s473_s18, 128, %s791_s5, [#allocation4]  }
 0x212   :  { %666 = dma.done.wait [#allocation4], 128  }
 0x213   :  { %667 = vsyncadd [#allocation4], 4294967168 }
 0x214   :  { %479 = vsyncpa [#allocation3], 1 }
 0x215   :  { %480 = vsyncpa [#allocation4], 1 }

</bundles_post_ra>
